<compile_context>
chip_gen: v6e
topology: v6e:2x2x1
jax: 0.10.0
libtpu: 0.0.40
codegen_flags: <defaults>
</compile_context>

<pallas_src>
import jax
import jax.numpy as jnp
from jax.experimental import pallas as pl
from jax.experimental.pallas import tpu as pltpu

_MIB = 1024 * 1024


def _update_y_kernel(mu_ref, g_ref, z_ref, y_ref, out_ref):
    # mu_ref lives in SMEM: a single f32 scalar mu[i].
    mu = mu_ref[0]
    g = g_ref[...].astype(jnp.float32)
    z = z_ref[...].astype(jnp.float32)
    y = y_ref[...].astype(jnp.float32)
    out_ref[...] = (y + mu * (g - z)).astype(out_ref.dtype)


def _vmem_capacity_bytes():
    """Trace-time VMEM capacity; conservative fallback (v7x per-TC) on error."""
    try:
        return int(pltpu.get_tpu_info().vmem_capacity_bytes)
    except Exception:
        return 64 * _MIB


def updating_y_layer(G_m_i, Z_m_i, Y_pre_i, mu, i, *, alias_y_pre=False):
    """Y_m_i = Y_pre_i + mu[i] * (G_m_i - Z_m_i) via a Pallas TPU kernel.

    G_m_i, Z_m_i, Y_pre_i: arrays of identical shape (e.g. NCHW [B,C,H,W]).
    mu: 1D array of scalars (one per unrolled iteration); i selects mu[i].
    alias_y_pre: alias Y_pre's buffer onto the output. Only a true in-place
                 update if the caller donates Y_pre_i (jit donate_argnums /
                 .delete); otherwise XLA inserts a defensive copy.
    """
    orig_shape = G_m_i.shape
    dtype = G_m_i.dtype
    total = int(G_m_i.size)
    itemsize = jnp.dtype(dtype).itemsize

    # mu stays f32 regardless of tensor dtype (matches PyTorch promotion).
    mu_i = jnp.asarray(mu, dtype=jnp.float32)[i].reshape(1)

    g_flat = G_m_i.reshape(-1)
    z_flat = Z_m_i.reshape(-1)
    y_flat = Y_pre_i.reshape(-1)

    # 128-aligned prefix goes through the kernel; the (<128 elem) tail is a
    # plain XLA epilogue (no full-array pad copies, no output slice copy).
    main = (total // 128) * 128
    tail = total - main

    if main == 0:
        # Tiny tensor (< 128 elements): a kernel launch is pure overhead.
        out = (y_flat.astype(jnp.float32)
               + mu_i[0] * (g_flat.astype(jnp.float32)
                            - z_flat.astype(jnp.float32))).astype(dtype)
        return out.reshape(orig_shape)

    # dtype-aware sublane multiple: native packed vreg tile is
    # (8, 128) f32, (16, 128) bf16, (32, 128) int8/fp8.
    sublane = 8 * max(1, 4 // itemsize)

    # Widest lane (multiple of 128, <= 4096) dividing the prefix; prefer one
    # that leaves >= 2*sublane rows so blocks fill whole vreg tiles and the
    # grid can have >= 2 steps.
    lane = None
    for cand in (4096, 2048, 1024, 512, 256, 128):
        if main % cand == 0 and (main // cand) >= 2 * sublane:
            lane = cand
            break
    if lane is None:
        for cand in (4096, 2048, 1024, 512, 256, 128):
            if main % cand == 0:
                lane = cand
                break
    rows = main // lane

    # Chip-aware block sizing: bigger blocks where VMEM allows it.
    vmem_cap = _vmem_capacity_bytes()
    target_block_bytes = 6 * _MIB if vmem_cap >= 96 * _MIB else 4 * _MIB

    block_rows = (target_block_bytes // (lane * itemsize)) // sublane * sublane
    block_rows = max(sublane, block_rows)
    if block_rows >= rows:
        if rows >= 2 * sublane:
            # Keep >= 2 grid steps so "parallel" can shard across v7x's two
            # TensorCores (neutral on v5e/v6e; per-step cost is ~0.35 us).
            block_rows = max(sublane, (rows // 2) // sublane * sublane)
        else:
            block_rows = rows          # single full-extent block (always legal)
    grid = (pl.cdiv(rows, block_rows),)

    # Derive the scoped-VMEM limit from the actual footprint:
    # 4 operands x 2 pipeline buffers x block + slack, clamped to the chip.
    block_bytes = block_rows * lane * itemsize
    vmem_limit = 4 * 2 * block_bytes + 4 * _MIB
    vmem_limit = int(min(max(vmem_limit, 16 * _MIB), vmem_cap))

    if tail:
        g_main, z_main, y_main = g_flat[:main], z_flat[:main], y_flat[:main]
    else:
        g_main, z_main, y_main = g_flat, z_flat, y_flat

    g2 = g_main.reshape(rows, lane)
    z2 = z_main.reshape(rows, lane)
    y2 = y_main.reshape(rows, lane)

    tile_spec = pl.BlockSpec((block_rows, lane), lambda r: (r, 0))

    out2 = pl.pallas_call(
        _update_y_kernel,
        out_shape=jax.ShapeDtypeStruct((rows, lane), dtype),
        grid_spec=pl.GridSpec(
            grid=grid,
            in_specs=[
                pl.BlockSpec(memory_space=pltpu.SMEM),  # mu[i] (f32 scalar)
                tile_spec,  # G
                tile_spec,  # Z
                tile_spec,  # Y_pre
            ],
            out_specs=tile_spec,
        ),
        # When the tail path slices the inputs, the alias would bind to a
        # temporary, so only request it on the zero-copy fast path.
        input_output_aliases=({3: 0} if (alias_y_pre and not tail) else {}),
        compiler_params=pltpu.CompilerParams(
            dimension_semantics=("parallel",),
            vmem_limit_bytes=vmem_limit,
        ),
    )(mu_i, g2, z2, y2)

    out_flat = out2.reshape(-1)
    if tail:
        tail_out = (y_flat[main:].astype(jnp.float32)
                    + mu_i[0] * (g_flat[main:].astype(jnp.float32)
                                 - z_flat[main:].astype(jnp.float32))
                    ).astype(dtype)
        out_flat = jnp.concatenate([out_flat, tail_out])
    return out_flat.reshape(orig_shape)


if __name__ == "__main__":
    key = jax.random.PRNGKey(0)
    kg, kz, ky = jax.random.split(key, 3)

    # Small NCHW shapes consistent with the module's usage.
    B, C, H, W = 2, 4, 16, 16
    n_layers = 5
    i = 2

    G_m_i = jax.random.normal(kg, (B, C, H, W), dtype=jnp.float32)
    Z_m_i = jax.random.normal(kz, (B, C, H, W), dtype=jnp.float32)
    Y_pre_i = jax.random.normal(ky, (B, C, H, W), dtype=jnp.float32)
    # deterministic parameter init for mu (module receives mu in __init__)
    mu = 0.1 + 0.05 * jnp.arange(n_layers, dtype=jnp.float32)

    Y_m_i = updating_y_layer(G_m_i, Z_m_i, Y_pre_i, mu, i)
    Y_m_i = jax.block_until_ready(Y_m_i)

    ref = Y_pre_i + mu[i] * (G_m_i - Z_m_i)
    assert Y_m_i.shape == (B, C, H, W)
    assert jnp.allclose(Y_m_i, ref, atol=1e-6, rtol=1e-6)

    # Also exercise the non-multiple-of-128 (prefix + XLA tail) path.
    shp2 = (3, 5, 7, 3)  # 315 elements
    kg2, kz2, ky2 = jax.random.split(jax.random.PRNGKey(1), 3)
    G2 = jax.random.normal(kg2, shp2, dtype=jnp.float32)
    Z2 = jax.random.normal(kz2, shp2, dtype=jnp.float32)
    Y2 = jax.random.normal(ky2, shp2, dtype=jnp.float32)
    O2 = jax.block_until_ready(updating_y_layer(G2, Z2, Y2, mu, i))
    ref2 = Y2 + mu[i] * (G2 - Z2)
    assert O2.shape == shp2
    assert jnp.allclose(O2, ref2, atol=1e-6, rtol=1e-6)

    print("KERNEL_OK")
</pallas_src>

<mosaic_0001>
module attributes {stable_mosaic.version = 11 : i64} {
  func.func @_update_y_kernel(%arg0: i32, %arg1: memref<1xf32, #tpu.memory_space<smem>>, %arg2: memref<8x128xf32, #tpu.memory_space<vmem>>, %arg3: memref<8x128xf32, #tpu.memory_space<vmem>>, %arg4: memref<8x128xf32, #tpu.memory_space<vmem>>, %arg5: memref<8x128xf32, #tpu.memory_space<vmem>>) attributes {dimension_semantics = [#tpu.dimension_semantics<parallel>], iteration_bounds = array<i64: 2>, scalar_prefetch = 0 : i64, scratch_operands = 0 : i64, tpu.core_type = #tpu.core_type<tc>, window_params = [{transform_indices = @transform_0, window_bounds = array<i64: 1>}, {transform_indices = @transform_1, window_bounds = array<i64: 8, 128>}, {transform_indices = @transform_2, window_bounds = array<i64: 8, 128>}, {transform_indices = @transform_3, window_bounds = array<i64: 8, 128>}, {transform_indices = @transform_4, window_bounds = array<i64: 8, 128>}]} {
    %c0 = arith.constant 0 : index
    %0 = memref.load %arg1[%c0] : memref<1xf32, #tpu.memory_space<smem>>
    %c0_0 = arith.constant 0 : index
    %c0_1 = arith.constant 0 : index
    %1 = vector.load %arg2[%c0_0, %c0_1] : memref<8x128xf32, #tpu.memory_space<vmem>>, vector<8x128xf32>
    %c0_2 = arith.constant 0 : index
    %c0_3 = arith.constant 0 : index
    %2 = vector.load %arg3[%c0_2, %c0_3] : memref<8x128xf32, #tpu.memory_space<vmem>>, vector<8x128xf32>
    %c0_4 = arith.constant 0 : index
    %c0_5 = arith.constant 0 : index
    %3 = vector.load %arg4[%c0_4, %c0_5] : memref<8x128xf32, #tpu.memory_space<vmem>>, vector<8x128xf32>
    %4 = arith.subf %1, %2 : vector<8x128xf32>
    %5 = vector.broadcast %0 : f32 to vector<8x128xf32>
    %6 = arith.mulf %5, %4 : vector<8x128xf32>
    %7 = arith.addf %3, %6 : vector<8x128xf32>
    %c0_6 = arith.constant 0 : index
    %c0_7 = arith.constant 0 : index
    %8 = vector.load %arg5[%c0_6, %c0_7] : memref<8x128xf32, #tpu.memory_space<vmem>>, vector<8x128xf32>
    tpu.vector_store %arg5[%c0_6, %c0_7], %7 {strides = array<i32>} : memref<8x128xf32, #tpu.memory_space<vmem>>, vector<8x128xf32>,
    return
  }
  func.func @transform_0(%arg0: i32) -> i32 {
    %c0_i32 = arith.constant 0 : i32
    %c0_i32_0 = arith.constant 0 : i32
    return %c0_i32 : i32
  }
  func.func @transform_1(%arg0: i32) -> (i32, i32) {
    %c0_i32 = arith.constant 0 : i32
    %c0_i32_0 = arith.constant 0 : i32
    return %arg0, %c0_i32 : i32, i32
  }
  func.func @transform_2(%arg0: i32) -> (i32, i32) {
    %c0_i32 = arith.constant 0 : i32
    %c0_i32_0 = arith.constant 0 : i32
    return %arg0, %c0_i32 : i32, i32
  }
  func.func @transform_3(%arg0: i32) -> (i32, i32) {
    %c0_i32 = arith.constant 0 : i32
    %c0_i32_0 = arith.constant 0 : i32
    return %arg0, %c0_i32 : i32, i32
  }
  func.func @transform_4(%arg0: i32) -> (i32, i32) {
    %c0_i32 = arith.constant 0 : i32
    %c0_i32_0 = arith.constant 0 : i32
    return %arg0, %c0_i32 : i32, i32
  }
}

</mosaic_0001>

<bundles_post_ra>
// kernel: tpu_custom_call.1
= control target key start
LH: loop header
LB: loop body
LE: loop exit
PB: predicated region body
PF: predicated region fallthrough
CT: control target
= control target key end

     0   :  { %s888_s0 = inlined_call_operand.<no memory space> [shape: f32[1], index: 0, kind: input, shape index: {}]   ;;  %s889_s1 = inlined_call_operand.hbm [shape: f32[16,128], index: 1, kind: input, shape index: {}]   ;;  %s890_s2 = inlined_call_operand.hbm [shape: f32[16,128], index: 2, kind: input, shape index: {}]   ;;  %s891_s3 = inlined_call_operand.hbm [shape: f32[16,128], index: 3, kind: input, shape index: {}]   ;;  %s892_s4 = inlined_call_operand.hbm [shape: f32[16,128], index: 4, kind: output, shape index: {}]  }
   0x1   :  { %896 = sst [smem:[#allocation14_spill]] %s889_s1 }
   0x2   :  { %897 = sst [smem:[#allocation15_spill]] %s890_s2 }
   0x3   :  { %9 = sst [smem:[#allocation2]] %s888_s0 }
   0x4   :  { %10 = vsyncpa [#allocation4], 0 }
   0x5   :  { %12 = vsyncpa [#allocation4 + $0x1], 0 }
   0x6   :  { %13 = vsyncpa [#allocation7], 0 }
   0x7   :  { %15 = vsyncpa [#allocation7 + $0x1], 0 }
   0x8   :  { %16 = vsyncpa [#allocation5], 0 }
   0x9   :  { %18 = vsyncpa [#allocation5 + $0x1], 0  ;;  %s681_s17 = smov 0   ;;  %s683_s18 = smov 0  }
   0xa   :  { %s685_s19 = smov 0   ;;  %s687_s20 = smov 0  }
   0xb LB: > { %s702_s0 = sadd.s32 4294967295, %s647_s20   ;;  %s421_s21 = sadd.s32 4294967294, %s647_s20   ;;  %s647_s20 = sphi %s687_s20, %s918_s20   ;;  %s643_s19 = sphi %s685_s19, %s917_s19   ;;  %s639_s18 = sphi %s683_s18, %s916_s18   ;;  %s635_s17 = sphi %s681_s17, %s915_s17  }
   0xc   : > { %s706_s22 = sadd.s32 1, %s647_s20   ;;  %s52_s23 = sadd.s32 1, %s643_s19 }
   0xd   : > { %s49_s24 = ssub.s32 %s647_s20, %s706_s22  ;;  %p59_p0 = scmp.ne.s32.totalorder %s643_s19, %s639_s18 }
   0xe   : > { %p50_p1 = scmp.eq.s32.totalorder %s49_s24, 0  ;;  %p60_p2 = scmp.eq.s32.totalorder %s647_s20, 0 }
   0xf   : > { %p65_p3 = scmp.ne.s32.totalorder %s639_s18, %s635_s17  ;;  %p66_p4 = scmp.eq.s32.totalorder %s702_s0, 0 }
  0x10   : > { %s718_s25 = scalar_select %p50_p1, %s643_s19, %s52_s23  }
  0x11   : > { %p61_p5 = por %p60_p2, %p59_p0  ;;  %p720_p6 = por %p66_p4, %p65_p3 }
  0x12   : > { %898 = sst [smem:[#allocation13_spill]] %s718_s25  ;;  %p141_p7 = scmp.eq.s32.totalorder %s702_s0, 1 }
  0x13   : > { %s899_s26 = scalar_select %p720_p6, 1, 0 }
  0x14   : > { %p147_p8 = scmp.eq.s32.totalorder %s421_s21, 1  ;;  %p461_p10 = scmp.lt.s32.totalorder %s647_s20, 2 }
  0x15   : > { %p727_p11 = por %p141_p7, %p59_p0  ;;  %s893_s29 = sand.u32 1, %s643_s19  }
  0x16   : > { %p731_p12 = por %p147_p8, %p65_p3  ;;  %s737_s30 = sshll.u32 %s647_s20, 7 }
  0x17   : > { %s900_s27 = scalar_select %p727_p11, 1, 0 }
  0x18   : > { %s901_s28 = scalar_select %p731_p12, 1, 0 }
  0x19   : > { %s741_s5 = sshll.u32 %s893_s29, 3  ;;  %p743_p13 = pnand %p461_p10, %p61_p5 }
  0x1a   : > { %s188_s7 = sand.u32 1, %s647_s20   ;;  %s903_s2 = sld [smem:[#allocation15_spill]] }
  0x1b   : > { %s192_s11 = scalar_lea.vmem [#allocation6], %s741_s5  ;;  %s756_s13 = scalar_lea.sflag [#allocation7], %s188_s7 }
  0x1c   : > { %s199_s12 = sshll.u32 %s192_s11, 4  ;;  %p762_p2 = pneg %p743_p13  ;;  %s200_s12 = int_to_ptr.vmem [resolvable:$true] %s199_s12 }
  0x20   : > { %s752_s10 = scalar_lea.hbm %s903_s2, %s737_s30  ;;  %s500_s23 = scalar_lea.hbm %s903_s2, 256 }
  0x21   : > { %s495_s14 = scalar_lea.hbm %s752_s10, 128  ;;  %p501_p5 = scmp.lt.s32.totalorder %s752_s10, %s903_s2 }
  0x22   : > { %p496_p1 = scmp.ne.s32.totalorder %s752_s10, %s495_s14  ;;  %p502_p7 = scmp.lt.s32.totalorder %s500_s23, %s495_s14 }
  0x24   : > { %p498_p3 = pnand %p762_p2, %p496_p1  ;;  %p503_p8 = por %p502_p7, %p501_p5 }
  0x26   : > { %p499_p4 = pneg %p498_p3 }
  0x28   : > { %p504_p10 = pnand %p503_p8, %p499_p4 }
  0x2a   : > { %507 = shalt.err (!%p504_p10)
}
  0x2b   : > { %s508_s7 = scalar_lea.vmem %s200_s12, 128  ;;  %s649_s9 = smov [#allocation6]  }
  0x2c   : > { %p509_p9 = scmp.ne.s32.totalorder %s200_s12, %s508_s7  ;;  %s513_s11 = sshll.u32 %s649_s9, 4  ;;  %s514_s11 = int_to_ptr.vmem [resolvable:$false] %s513_s11 }
  0x2d   : > { %s515_s29 = scalar_lea.vmem %s514_s11, 256  ;;  %p516_p1 = scmp.lt.s32.totalorder %s200_s12, %s514_s11 }
  0x2e   : > { %p511_p0 = pnand %p509_p9, %p762_p2  ;;  %p517_p3 = scmp.lt.s32.totalorder %s515_s29, %s508_s7 }
  0x30   : > { %p512_p12 = pneg %p511_p0  ;;  %p518_p11 = por %p517_p3, %p516_p1 }
  0x32   : > { %p519_p6 = pnand %p518_p11, %p512_p12 }
  0x34   : > { %522 = shalt.err (!%p519_p6)
}
  0x35   : > { %453 = dma.hbm_to_vmem [thread:$0]  (!%p743_p13), %s752_s10, 128, %s200_s12, %s756_s13  }
  0x36   : > { %p222_p9 = scmp.lt.s32.totalorder %s647_s20, 3  ;;  %s905_s1 = sld [smem:[#allocation14_spill]] }
  0x37   : > { %p906_p0 = scmp.ge.s32.totalorder %s647_s20, 1  ;;  %s174_s23 = scalar_lea.vmem [#allocation3], %s741_s5 }
  0x38   : > { %s181_s24 = sshll.u32 %s174_s23, 4  ;;  %s908_s8 = sand.u32 1, %s643_s19   ;;  %s182_s24 = int_to_ptr.vmem [resolvable:$true] %s181_s24 }
  0x39   : > { %p790_p6 = pnand %p906_p0, %p222_p9  ;;  %s171_s7 = scalar_lea.sflag [#allocation4], %s908_s8 }
  0x3b   : > { %s907_s29 = scalar_select %p790_p6, 1, 0 }
  0x3c   : > { %s786_s21 = scalar_lea.hbm %s905_s1, %s737_s30  ;;  %s528_s11 = scalar_lea.hbm %s905_s1, 256 }
  0x3d   : > { %s523_s10 = scalar_lea.hbm %s786_s21, 128  ;;  %p529_p5 = scmp.lt.s32.totalorder %s786_s21, %s905_s1 }
  0x3e   : > { %p524_p11 = scmp.ne.s32.totalorder %s786_s21, %s523_s10  ;;  %p530_p7 = scmp.lt.s32.totalorder %s528_s11, %s523_s10 }
  0x40   : > { %p526_p12 = pnand %p524_p11, %p762_p2  ;;  %p531_p8 = por %p530_p7, %p529_p5 }
  0x42   : > { %p527_p4 = pneg %p526_p12 }
  0x44   : > { %p532_p10 = pnand %p531_p8, %p527_p4 }
  0x46   : > { %535 = shalt.err (!%p532_p10)
}
  0x47   : > { %s536_s23 = scalar_lea.vmem %s182_s24, 128  ;;  %s650_s8 = smov [#allocation3]  }
  0x48   : > { %p537_p1 = scmp.ne.s32.totalorder %s182_s24, %s536_s23  ;;  %s541_s2 = sshll.u32 %s650_s8, 4  ;;  %s542_s2 = int_to_ptr.vmem [resolvable:$false] %s541_s2 }
  0x49   : > { %s543_s25 = scalar_lea.vmem %s542_s2, 256  ;;  %p544_p0 = scmp.lt.s32.totalorder %s182_s24, %s542_s2 }
  0x4a   : > { %p539_p3 = pnand %p537_p1, %p762_p2  ;;  %p545_p11 = scmp.lt.s32.totalorder %s543_s25, %s536_s23 }
  0x4c   : > { %p540_p9 = pneg %p539_p3  ;;  %p546_p12 = por %p545_p11, %p544_p0 }
  0x4e   : > { %p547_p6 = pnand %p546_p12, %p540_p9 }
  0x50   : > { %550 = shalt.err (!%p547_p6)
}
  0x51   : > { %450 = dma.hbm_to_vmem [thread:$0]  (!%p743_p13), %s786_s21, 128, %s182_s24, %s171_s7  }
  0x52   : > { %s215_s9 = scalar_lea.hbm %s891_s3, %s737_s30  ;;  %s210_s11 = scalar_lea.vmem [#allocation8], %s741_s5 }
  0x53   : > { %s217_s14 = sshll.u32 %s210_s11, 4  ;;  %s551_s16 = scalar_lea.hbm %s215_s9, 128  ;;  %s218_s14 = int_to_ptr.vmem [resolvable:$true] %s217_s14 }
  0x54   : > { %p552_p4 = scmp.ne.s32.totalorder %s215_s9, %s551_s16  ;;  %s556_s23 = scalar_lea.hbm %s891_s3, 256 }
  0x55   : > { %p557_p6 = scmp.lt.s32.totalorder %s215_s9, %s891_s3  ;;  %p558_p8 = scmp.lt.s32.totalorder %s556_s23, %s551_s16 }
  0x56   : > { %p554_p5 = pnand %p552_p4, %p762_p2 }
  0x57   : > { %p559_p10 = por %p558_p8, %p557_p6 }
  0x58   : > { %p555_p7 = pneg %p554_p5 }
  0x5a   : > { %p560_p1 = pnand %p559_p10, %p555_p7 }
  0x5c   : > { %563 = shalt.err (!%p560_p1)
}
  0x5d   : > { %s564_s30 = scalar_lea.vmem %s218_s14, 128  ;;  %s651_s5 = smov [#allocation8]  }
  0x5e   : > { %p565_p3 = scmp.ne.s32.totalorder %s218_s14, %s564_s30  ;;  %s569_s21 = sshll.u32 %s651_s5, 4  ;;  %s570_s21 = int_to_ptr.vmem [resolvable:$false] %s569_s21 }
  0x5f   : > { %s571_s24 = scalar_lea.vmem %s570_s21, 256  ;;  %p572_p11 = scmp.lt.s32.totalorder %s218_s14, %s570_s21 }
  0x60   : > { %p567_p9 = pnand %p565_p3, %p762_p2  ;;  %p573_p12 = scmp.lt.s32.totalorder %s571_s24, %s564_s30 }
  0x62   : > { %p568_p0 = pneg %p567_p9  ;;  %p574_p4 = por %p573_p12, %p572_p11 }
  0x64   : > { %p575_p5 = pnand %p574_p4, %p568_p0 }
  0x66   : > { %578 = shalt.err (!%p575_p5)
}
  0x67   : > { %456 = dma.hbm_to_vmem [thread:$0]  (!%p743_p13), %s215_s9, 128, %s218_s14, %s756_s13  }
  0x68   : > { %p909_p7 = scmp.ne.s32.totalorder %s907_s29, 0 }
  0x69   : > { %s834_s1 = sand.u32 (!%p909_p7), 1, %s639_s18   ;;  %p910_p2 = scmp.ne.s32.totalorder (!%p909_p7), %s899_s26, 0 }
  0x6a   : > { %226 = sbr.rel (%p909_p7) target bundleno = 141 (0x8d), region = 36  ;;  %s431_s15 = sshll.u32 (!%p909_p7), %s834_s1, 3 }
  0x6b   : > { %s229_s7 = scalar_lea.sflag (!%p909_p7), [#allocation4], %s834_s1  ;;  %s232_s10 = scalar_lea.vmem (!%p909_p7), [#allocation3], %s431_s15 }
  0x6f   : > { %622 = dma.done.wait (%p910_p2), %s229_s7, 128  }
  0x70   : > { %624 = vsyncadd (%p910_p2), %s229_s7, 4294967168  ;;  %s237_s6 = sand.u32 1, %s702_s0   ;;  %s241_s29 = scalar_lea.vmem [#allocation6], %s431_s15 }
  0x71   : > { %s238_s13 = scalar_lea.sflag [#allocation7], %s237_s6 }
  0x72   : > { %626 = dma.done.wait (%p910_p2), %s238_s13, 256  }
  0x73   : > { %628 = vsyncadd (%p910_p2), %s238_s13, 4294967040  ;;  %s285_s12 = sld [smem:[#allocation2]]  ;;  %v286_v0 = vld [vmem:[%s232_s10] sm:$0xff]  ;;  %v287_v1 = vld [vmem:[%s241_s29] sm:$0xff]  ;;  %s284_s9 = scalar_lea.vmem [#allocation9], %s431_s15 }
  0x74   : > { %v289_v3 = vsub.f32 %v286_v0, %v287_v1  ;;  %s308_s11 = sshll.u32 %s284_s9, 4  ;;  %s250_s14 = scalar_lea.vmem [#allocation8], %s431_s15  ;;  %s848_s11 = int_to_ptr.vmem [resolvable:$true] %s308_s11 }
  0x75   : > { %v288_v4 = vld [vmem:[%s250_s14] sm:$0xff]  ;;  %s436_s16 = sshll.u32 %s702_s0, 7  ;;  %s295_s23 = scalar_lea.sflag [#allocation5], %s834_s1 }
  0x76   : > { %s306_s25 = scalar_lea.hbm %s892_s4, %s436_s16  ;;  %s579_s8 = scalar_lea.vmem %s848_s11, 128 }
  0x77   : > { %p580_p13 = scmp.ne.s32.totalorder %s848_s11, %s579_s8  ;;  %p911_p6 = scmp.ne.s32.totalorder %s900_s27, 0 }
  0x78   : > { %s652_s30 = smov [#allocation9]  }
  0x79   : > { %v290_v2 = vstv %s285_s12  ;;  %p581_p8 = pnand %p580_p13, %p911_p6  ;;  %s583_s0 = sshll.u32 %s652_s30, 4  ;;  %s584_s0 = int_to_ptr.vmem [resolvable:$false] %s583_s0 }
  0x7a   : > { %v291_v5 = vmul.f32 %v290_v2, %v289_v3  ;;  %s585_s5 = scalar_lea.vmem %s584_s0, 256  ;;  %p586_p1 = scmp.lt.s32.totalorder %s848_s11, %s584_s0 }
  0x7b   : > { %p582_p10 = pneg %p581_p8  ;;  %p587_p3 = scmp.lt.s32.totalorder %s585_s5, %s579_s8 }
  0x7c   : > { %v292_v6 = vadd.f32 %v291_v5, %v288_v4 }
  0x7d   : > { %p588_p9 = por %p587_p3, %p586_p1 }
  0x7e   : > { %293 = vst [vmem:[%s284_s9] sm:$0xff] %v292_v6 }
  0x7f   : > { %p589_p0 = pnand %p588_p9, %p582_p10 }
  0x81   : > { %592 = shalt.err (!%p589_p0)
}
  0x82   : > { %s593_s21 = scalar_lea.hbm %s306_s25, 128  ;;  %s597_s15 = scalar_lea.hbm %s892_s4, 256 }
  0x83   : > { %p594_p11 = scmp.ne.s32.totalorder %s306_s25, %s593_s21  ;;  %p598_p5 = scmp.lt.s32.totalorder %s306_s25, %s892_s4 }
  0x84   : > { %p599_p7 = scmp.lt.s32.totalorder %s597_s15, %s593_s21 }
  0x85   : > { %p595_p12 = pnand %p594_p11, %p911_p6 }
  0x86   : > { %p600_p2 = por %p599_p7, %p598_p5 }
  0x87   : > { %p596_p4 = pneg %p595_p12 }
  0x89   : > { %p601_p13 = pnand %p600_p2, %p596_p4 }
  0x8b   : > { %604 = shalt.err (!%p601_p13)
}
  0x8c   : > { %445 = dma.vmem_to_hbm [thread:$0]  (%p911_p6), %s848_s11, 128, %s306_s25, %s295_s23  }
  0x8d PF: > { %s320_s6 = sand.u32 1, %s635_s17   ;;  %p912_p8 = scmp.ne.s32.totalorder %s901_s28, 0 }
  0x8e   : > { %p913_p10 = scmp.ge.s32.totalorder %s647_s20, 2  ;;  %s321_s13 = scalar_lea.sflag [#allocation5], %s320_s6 }
  0x90   : > { %p458_p1 = pnand %p913_p10, %p912_p8 }
  0x92   : > { %p459_p3 = pneg %p458_p1 }
  0x94   : > { %630 = dma.done.wait (%p459_p3), %s321_s13, 128  }
  0x95   : > { %632 = vsyncadd (%p459_p3), %s321_s13, 4294967168  ;;  %s914_s29 = sld [smem:[#allocation13_spill]]  ;;  %p21_p9 = scmp.ge.s32.totalorder %s706_s22, 4  }
  0x96   : > { %s915_s17 = smov %s639_s18  ;;  %s916_s18 = smov %s643_s19 }
  0x97   : > { %s918_s20 = smov %s706_s22  ;;  %23 = sbr.rel (!%p21_p9) target bundleno = 11 (0xb), region = 105 }
  0x9b   : > { %s917_s19 = smov %s914_s29 }
  0x9c   :  { %326 = vsyncpa [#allocation4], 1 }
  0x9d   :  { %328 = vsyncpa [#allocation4 + $0x1], 1 }
  0x9e   :  { %329 = vsyncpa [#allocation7], 1 }
  0x9f   :  { %331 = vsyncpa [#allocation7 + $0x1], 1 }
  0xa0   :  { %332 = vsyncpa [#allocation5], 1 }
  0xa1   :  { %334 = vsyncpa [#allocation5 + $0x1], 1 }

</bundles_post_ra>
